<compile_context>
chip_gen: v7x
topology: tpu7x:2x2x1
jax: 0.10.0
libtpu: 0.0.40
codegen_flags: <defaults>
</compile_context>

<pallas_src>
import jax
import jax.numpy as jnp
from jax.experimental import pallas as pl
from jax.experimental.pallas import tpu as pltpu

_LANE = 128
_SUBLANE = 8


def _round_up(x: int, m: int) -> int:
    return ((x + m - 1) // m) * m


def _cdiv(a: int, b: int) -> int:
    return -(-a // b)


def _make_actor_kernel(max_action: float):
    def actor_kernel(x_ref, w1_ref, b1_ref, w2_ref, b2_ref, w3_ref, b3_ref, o_ref):
        # Layer 1: (TB, S) @ (S, H1p); f32 MXU accumulation, f32 elementwise.
        # (K=S is tiny; flops are negligible, so the near-empty MXU pass is fine —
        #  the kernel is step/latency bound, not vex-slot bound.)
        h = jnp.dot(x_ref[...], w1_ref[...],
                    preferred_element_type=jnp.float32) + b1_ref[...]
        h = jnp.maximum(h, 0.0)
        # Layer 2: (TB, H1p) @ (H1p, H2p)
        h = jnp.dot(h.astype(w2_ref.dtype), w2_ref[...],
                    preferred_element_type=jnp.float32) + b2_ref[...]
        h = jnp.maximum(h, 0.0)
        # Layer 3 + tanh + scale: (TB, H2p) @ (H2p, Ap)
        h = jnp.dot(h.astype(w3_ref.dtype), w3_ref[...],
                    preferred_element_type=jnp.float32) + b3_ref[...]
        o_ref[...] = (max_action * jnp.tanh(h)).astype(o_ref.dtype)

    return actor_kernel


def _pad2d(a, rows: int, cols: int):
    return jnp.pad(a, ((0, rows - a.shape[0]), (0, cols - a.shape[1])))


def prepare_actor_params(params, compute_dtype=jnp.bfloat16):
    """Pad feature dims to 128-lane multiples and cast weights ONCE.

    Zero padding is exact: padded hidden columns see relu(0 + 0) = 0 and the
    matching padded weight rows are 0, so downstream dots are unchanged.
    Returns (prepared_arrays, dims) where dims carries the logical sizes.
    """
    w1, b1, w2, b2, w3, b3 = (params[k] for k in ("w1", "b1", "w2", "b2", "w3", "b3"))
    S, H1 = w1.shape
    H2, A = w2.shape[1], w3.shape[1]
    H1p, H2p, Ap = (_round_up(d, _LANE) for d in (H1, H2, A))

    prepared = dict(
        w1=_pad2d(w1, S, H1p).astype(compute_dtype),
        b1=_pad2d(b1, 1, H1p).astype(jnp.float32),
        w2=_pad2d(w2, H1p, H2p).astype(compute_dtype),
        b2=_pad2d(b2, 1, H2p).astype(jnp.float32),
        w3=_pad2d(w3, H2p, Ap).astype(compute_dtype),
        b3=_pad2d(b3, 1, Ap).astype(jnp.float32),
    )
    dims = {"state_dim": S, "action_dim": A}
    return prepared, dims


def actor_forward(state, prepared, action_dim: int, max_action: float, *,
                  out_dtype=jnp.float32, block_b: int = 512, min_blocks: int = 1):
    """state: (B, state_dim) f32. prepared: output of prepare_actor_params.

    out_dtype: jnp.bfloat16 halves the padded-output writeback if downstream
    accepts it. min_blocks=2 keeps >=2 batch tiles so v7x megacore sharding
    has work on both TensorCores.
    """
    w1p, b1p = prepared["w1"], prepared["b1"]
    w2p, b2p = prepared["w2"], prepared["b2"]
    w3p, b3p = prepared["w3"], prepared["b3"]
    B, S = state.shape
    assert S == w1p.shape[0], (S, w1p.shape)
    H1p, H2p, Ap = w1p.shape[1], w2p.shape[1], w3p.shape[1]
    compute_dtype = w1p.dtype

    # Batch tiling: as few grid steps as possible (per-step Pallas overhead
    # ~0.35 us dominates the ~0.1 us per-step compute), with <8 rows of
    # padding waste per tile.
    nb = max(int(min_blocks), _cdiv(B, block_b))
    nb = min(nb, max(1, _cdiv(B, _SUBLANE)))          # keep TB >= 8
    TB = _round_up(_cdiv(B, nb), _SUBLANE)
    nb = _cdiv(B, TB)
    Bp = nb * TB

    # Stream the state already in compute dtype (halves input DMA for bf16,
    # removes the per-step in-kernel cast).
    x_p = jnp.pad(state, ((0, Bp - B), (0, 0))).astype(compute_dtype)

    def resident(shape):
        # Same block every grid step -> fetched once, stays VMEM-resident.
        return pl.BlockSpec(shape, lambda i: (0, 0))

    def isz(dt):
        return jnp.dtype(dt).itemsize

    weight_bytes = sum(int(a.size) * a.dtype.itemsize
                       for a in (w1p, b1p, w2p, b2p, w3p, b3p))
    flops = 2 * Bp * (S * H1p + H1p * H2p + H2p * Ap)
    bytes_accessed = weight_bytes + Bp * S * isz(compute_dtype) + Bp * Ap * isz(out_dtype)

    # Scoped-VMEM estimate: double-buffered x/out blocks + (conservatively
    # double-buffered) resident weights + f32 intermediates. Only override
    # the default limit when a large batch tile would exceed v5e's 16 MiB
    # default scoped limit; cap below v7x's 64 MiB physical VMEM.
    vmem_est = (2 * weight_bytes
                + 2 * TB * S * isz(compute_dtype)
                + 2 * TB * Ap * isz(out_dtype)
                + TB * (H1p + H2p + Ap) * 4)
    vmem_limit = None
    if vmem_est > 12 * 1024 * 1024:
        vmem_limit = min(int(1.5 * vmem_est), 64 * 1024 * 1024)

    out = pl.pallas_call(
        _make_actor_kernel(float(max_action)),
        out_shape=jax.ShapeDtypeStruct((Bp, Ap), out_dtype),
        grid=(nb,),
        in_specs=[
            pl.BlockSpec((TB, S), lambda i: (i, 0)),   # streamed activation block
            resident(w1p.shape), resident(b1p.shape),
            resident(w2p.shape), resident(b2p.shape),
            resident(w3p.shape), resident(b3p.shape),
        ],
        out_specs=pl.BlockSpec((TB, Ap), lambda i: (i, 0)),
        compiler_params=pltpu.CompilerParams(
            dimension_semantics=("parallel",),  # megacore-shard the batch axis (v7x)
            vmem_limit_bytes=vmem_limit,
        ),
        cost_estimate=pl.CostEstimate(
            flops=flops,
            transcendentals=Bp * Ap,            # tanh
            bytes_accessed=bytes_accessed,
        ),
    )(x_p, w1p, b1p, w2p, b2p, w3p, b3p)

    return out[:B, :action_dim]


def init_actor_params(key, state_dim, action_dim):
    """PyTorch nn.Linear-style init: U(-1/sqrt(fan_in), +1/sqrt(fan_in))."""
    def linear(key, fan_in, fan_out):
        kw, kb = jax.random.split(key)
        bound = 1.0 / jnp.sqrt(jnp.float32(fan_in))
        w = jax.random.uniform(kw, (fan_in, fan_out), jnp.float32, -bound, bound)
        b = jax.random.uniform(kb, (1, fan_out), jnp.float32, -bound, bound)
        return w, b

    k1, k2, k3 = jax.random.split(key, 3)
    w1, b1 = linear(k1, state_dim, 400)
    w2, b2 = linear(k2, 400, 300)
    w3, b3 = linear(k3, 300, action_dim)
    return {"w1": w1, "b1": b1, "w2": w2, "b2": b2, "w3": w3, "b3": b3}


def actor_reference(state, params, max_action: float, compute_dtype=jnp.float32):
    """Plain-JAX reference; compute_dtype mimics the kernel's MXU-input dtype."""
    def dense(x, w, b):
        return jnp.dot(x.astype(compute_dtype), w.astype(compute_dtype),
                       preferred_element_type=jnp.float32) + b.astype(jnp.float32)

    a = jnp.maximum(dense(state, params["w1"], params["b1"]), 0.0)
    a = jnp.maximum(dense(a, params["w2"], params["b2"]), 0.0)
    return max_action * jnp.tanh(dense(a, params["w3"], params["b3"]))


if __name__ == "__main__":
    key = jax.random.PRNGKey(0)
    k_params, k_state, k_state_big = jax.random.split(key, 3)

    state_dim = 16
    action_dim = 4
    max_action = 2.0
    params = init_actor_params(k_params, state_dim, action_dim)

    # --- tiny batch (B=2), exact f32 path (matches the PyTorch module's math) ---
    prep_f32, dims = prepare_actor_params(params, compute_dtype=jnp.float32)
    fwd_f32 = jax.jit(lambda s: actor_forward(s, prep_f32, dims["action_dim"], max_action))
    state = jax.random.normal(k_state, (2, state_dim), jnp.float32)
    out_f32 = jax.block_until_ready(fwd_f32(state))
    ref_f32 = actor_reference(state, params, max_action)
    assert out_f32.shape == (2, action_dim), out_f32.shape
    assert jnp.allclose(out_f32, ref_f32, atol=1e-4, rtol=1e-4), (out_f32, ref_f32)

    # --- larger batch (B=300): multi-tile grid (min_blocks=2 for v7x megacore),
    #     bf16-weight fast path, <8 rows of batch padding per tile ---
    prep_bf16, dims = prepare_actor_params(params, compute_dtype=jnp.bfloat16)
    fwd_bf16 = jax.jit(lambda s: actor_forward(
        s, prep_bf16, dims["action_dim"], max_action, block_b=128, min_blocks=2))
    state_big = jax.random.normal(k_state_big, (300, state_dim), jnp.float32)
    out_bf16 = jax.block_until_ready(fwd_bf16(state_big))
    ref_bf16 = actor_reference(state_big, params, max_action, compute_dtype=jnp.bfloat16)
    ref_big_f32 = actor_reference(state_big, params, max_action)
    assert out_bf16.shape == (300, action_dim), out_bf16.shape
    assert jnp.allclose(out_bf16, ref_bf16, atol=2e-2, rtol=2e-2)
    assert jnp.allclose(out_bf16, ref_big_f32, atol=1e-1, rtol=1e-1)

    print("KERNEL_OK")
</pallas_src>

<mosaic_0001>
module attributes {stable_mosaic.version = 11 : i64} {
  func.func @actor_kernel(%arg0: i32, %arg1: memref<8x16xf32, #tpu.memory_space<vmem>>, %arg2: memref<16x512xf32, #tpu.memory_space<vmem>>, %arg3: memref<1x512xf32, #tpu.memory_space<vmem>>, %arg4: memref<512x384xf32, #tpu.memory_space<vmem>>, %arg5: memref<1x384xf32, #tpu.memory_space<vmem>>, %arg6: memref<384x128xf32, #tpu.memory_space<vmem>>, %arg7: memref<1x128xf32, #tpu.memory_space<vmem>>, %arg8: memref<8x128xf32, #tpu.memory_space<vmem>>) attributes {dimension_semantics = [#tpu.dimension_semantics<parallel>], iteration_bounds = array<i64: 1>, scalar_prefetch = 0 : i64, scratch_operands = 0 : i64, tpu.core_type = #tpu.core_type<tc>, window_params = [{transform_indices = @transform_0, window_bounds = array<i64: 8, 16>}, {pipeline_mode = #tpu.pipeline_mode<synchronous>, transform_indices = @transform_1, window_bounds = array<i64: 16, 512>}, {pipeline_mode = #tpu.pipeline_mode<synchronous>, transform_indices = @transform_2, window_bounds = array<i64: 1, 512>}, {pipeline_mode = #tpu.pipeline_mode<synchronous>, transform_indices = @transform_3, window_bounds = array<i64: 512, 384>}, {pipeline_mode = #tpu.pipeline_mode<synchronous>, transform_indices = @transform_4, window_bounds = array<i64: 1, 384>}, {pipeline_mode = #tpu.pipeline_mode<synchronous>, transform_indices = @transform_5, window_bounds = array<i64: 384, 128>}, {pipeline_mode = #tpu.pipeline_mode<synchronous>, transform_indices = @transform_6, window_bounds = array<i64: 1, 128>}, {transform_indices = @transform_7, window_bounds = array<i64: 8, 128>}]} {
    %c0 = arith.constant 0 : index
    %c0_0 = arith.constant 0 : index
    %0 = vector.load %arg1[%c0, %c0_0] : memref<8x16xf32, #tpu.memory_space<vmem>>, vector<8x16xf32>
    %c0_1 = arith.constant 0 : index
    %c0_2 = arith.constant 0 : index
    %1 = vector.load %arg2[%c0_1, %c0_2] : memref<16x512xf32, #tpu.memory_space<vmem>>, vector<16x512xf32>
    %cst = arith.constant dense<0.000000e+00> : vector<8x512xf32>
    %2 = tpu.matmul %0, %1, %cst {dimension_numbers = #tpu.dot_dimension_numbers<[1], [0], [0], [1], [0, 0, 1, 1], [], []>} : vector<8x16xf32>, vector<16x512xf32>, vector<8x512xf32> -> vector<8x512xf32>
    %c0_3 = arith.constant 0 : index
    %c0_4 = arith.constant 0 : index
    %3 = vector.load %arg3[%c0_3, %c0_4] : memref<1x512xf32, #tpu.memory_space<vmem>>, vector<1x512xf32>
    %4 = vector.broadcast %3 : vector<1x512xf32> to vector<8x512xf32>
    %5 = arith.addf %2, %4 : vector<8x512xf32>
    %cst_5 = arith.constant 0.000000e+00 : f32
    %6 = vector.broadcast %cst_5 : f32 to vector<8x512xf32>
    %7 = arith.maximumf %5, %6 : vector<8x512xf32>
    %c0_6 = arith.constant 0 : index
    %c0_7 = arith.constant 0 : index
    %8 = vector.load %arg4[%c0_6, %c0_7] : memref<512x384xf32, #tpu.memory_space<vmem>>, vector<512x384xf32>
    %cst_8 = arith.constant dense<0.000000e+00> : vector<8x384xf32>
    %9 = tpu.matmul %7, %8, %cst_8 {dimension_numbers = #tpu.dot_dimension_numbers<[1], [0], [0], [1], [0, 0, 1, 1], [], []>} : vector<8x512xf32>, vector<512x384xf32>, vector<8x384xf32> -> vector<8x384xf32>
    %c0_9 = arith.constant 0 : index
    %c0_10 = arith.constant 0 : index
    %10 = vector.load %arg5[%c0_9, %c0_10] : memref<1x384xf32, #tpu.memory_space<vmem>>, vector<1x384xf32>
    %11 = vector.broadcast %10 : vector<1x384xf32> to vector<8x384xf32>
    %12 = arith.addf %9, %11 : vector<8x384xf32>
    %cst_11 = arith.constant 0.000000e+00 : f32
    %13 = vector.broadcast %cst_11 : f32 to vector<8x384xf32>
    %14 = arith.maximumf %12, %13 : vector<8x384xf32>
    %c0_12 = arith.constant 0 : index
    %c0_13 = arith.constant 0 : index
    %15 = vector.load %arg6[%c0_12, %c0_13] : memref<384x128xf32, #tpu.memory_space<vmem>>, vector<384x128xf32>
    %cst_14 = arith.constant dense<0.000000e+00> : vector<8x128xf32>
    %16 = tpu.matmul %14, %15, %cst_14 {dimension_numbers = #tpu.dot_dimension_numbers<[1], [0], [0], [1], [0, 0, 1, 1], [], []>} : vector<8x384xf32>, vector<384x128xf32>, vector<8x128xf32> -> vector<8x128xf32>
    %c0_15 = arith.constant 0 : index
    %c0_16 = arith.constant 0 : index
    %17 = vector.load %arg7[%c0_15, %c0_16] : memref<1x128xf32, #tpu.memory_space<vmem>>, vector<1x128xf32>
    %18 = vector.broadcast %17 : vector<1x128xf32> to vector<8x128xf32>
    %19 = arith.addf %16, %18 : vector<8x128xf32>
    %20 = math.tanh %19 : vector<8x128xf32>
    %cst_17 = arith.constant 2.000000e+00 : f32
    %21 = vector.broadcast %cst_17 : f32 to vector<8x128xf32>
    %22 = arith.mulf %21, %20 : vector<8x128xf32>
    %c0_18 = arith.constant 0 : index
    %c0_19 = arith.constant 0 : index
    %23 = vector.load %arg8[%c0_18, %c0_19] : memref<8x128xf32, #tpu.memory_space<vmem>>, vector<8x128xf32>
    tpu.vector_store %arg8[%c0_18, %c0_19], %22 {strides = array<i32>} : memref<8x128xf32, #tpu.memory_space<vmem>>, vector<8x128xf32>,
    return
  }
  func.func @transform_0(%arg0: i32) -> (i32, i32) {
    %c0_i32 = arith.constant 0 : i32
    %c0_i32_0 = arith.constant 0 : i32
    return %arg0, %c0_i32 : i32, i32
  }
  func.func @transform_1(%arg0: i32) -> (i32, i32) {
    %c0_i32 = arith.constant 0 : i32
    %c0_i32_0 = arith.constant 0 : i32
    %c0_i32_1 = arith.constant 0 : i32
    return %c0_i32, %c0_i32_0 : i32, i32
  }
  func.func @transform_2(%arg0: i32) -> (i32, i32) {
    %c0_i32 = arith.constant 0 : i32
    %c0_i32_0 = arith.constant 0 : i32
    %c0_i32_1 = arith.constant 0 : i32
    return %c0_i32, %c0_i32_0 : i32, i32
  }
  func.func @transform_3(%arg0: i32) -> (i32, i32) {
    %c0_i32 = arith.constant 0 : i32
    %c0_i32_0 = arith.constant 0 : i32
    %c0_i32_1 = arith.constant 0 : i32
    return %c0_i32, %c0_i32_0 : i32, i32
  }
  func.func @transform_4(%arg0: i32) -> (i32, i32) {
    %c0_i32 = arith.constant 0 : i32
    %c0_i32_0 = arith.constant 0 : i32
    %c0_i32_1 = arith.constant 0 : i32
    return %c0_i32, %c0_i32_0 : i32, i32
  }
  func.func @transform_5(%arg0: i32) -> (i32, i32) {
    %c0_i32 = arith.constant 0 : i32
    %c0_i32_0 = arith.constant 0 : i32
    %c0_i32_1 = arith.constant 0 : i32
    return %c0_i32, %c0_i32_0 : i32, i32
  }
  func.func @transform_6(%arg0: i32) -> (i32, i32) {
    %c0_i32 = arith.constant 0 : i32
    %c0_i32_0 = arith.constant 0 : i32
    %c0_i32_1 = arith.constant 0 : i32
    return %c0_i32, %c0_i32_0 : i32, i32
  }
  func.func @transform_7(%arg0: i32) -> (i32, i32) {
    %c0_i32 = arith.constant 0 : i32
    %c0_i32_0 = arith.constant 0 : i32
    return %arg0, %c0_i32 : i32, i32
  }
}

</mosaic_0001>

<bundles_post_ra>
// kernel: _lambda_.1
= control target key start
LH: loop header
LB: loop body
LE: loop exit
PB: predicated region body
PF: predicated region fallthrough
CT: control target
= control target key end

     0   :  { %12 = vsyncpa [#allocation3], 0  ;;  %s1588_s0 = inlined_call_operand.vmem [shape: f32[8,16], index: 0, kind: input, shape index: {}]   ;;  %s1589_s1 = inlined_call_operand.hbm [shape: f32[16,512], index: 1, kind: input, shape index: {}]   ;;  %s1590_s2 = inlined_call_operand.vmem [shape: f32[1,512], index: 2, kind: input, shape index: {}]   ;;  %s1591_s3 = inlined_call_operand.hbm [shape: f32[512,384], index: 3, kind: input, shape index: {}]   ;;  %s1592_s4 = inlined_call_operand.vmem [shape: f32[1,384], index: 4, kind: input, shape index: {}]   ;;  %s1593_s5 = inlined_call_operand.hbm [shape: f32[384,128], index: 5, kind: input, shape index: {}]   ;;  %s1594_s6 = inlined_call_operand.vmem [shape: f32[1,128], index: 6, kind: input, shape index: {}]   ;;  %s1595_s7 = inlined_call_operand.vmem [shape: f32[8,128], index: 7, kind: output, shape index: {}]  }
   0x1   :  { %13 = vsyncpa [#allocation5], 0  ;;  %s1450_s24 = smov [#allocation4]   ;;  %s1380_s28 = scalar_lea.hbm %s1591_s3, 24576 }
   0x2   :  { %s35_s25 = sshll.u32 %s1450_s24, 4  ;;  %p1381_p0 = scmp.ne.s32.totalorder %s1591_s3, %s1380_s28  ;;  %s36_s25 = int_to_ptr.vmem [resolvable:$true] %s35_s25 }
   0x3   :  { %p1384_p1 = scmp.lt.u32.totalorder %s1380_s28, %s1591_s3 }
   0x5   :  { %p1386_p2 = pnand %p1384_p1, %p1381_p0 }
   0x7   :  { %1389 = shalt.err (!%p1386_p2)
}
   0x8   :  { %s1390_s10 = scalar_lea.vmem %s36_s25, 24576  ;;  %p1395_p4 = scmp.lt.s32.totalorder %s36_s25, %s36_s25 }
   0x9   :  { %p1391_p3 = scmp.ne.s32.totalorder %s36_s25, %s1390_s10  ;;  %p1396_p5 = scmp.lt.s32.totalorder %s1390_s10, %s1390_s10 }
   0xb   :  { %p1397_p6 = por %p1396_p5, %p1395_p4 }
   0xd   :  { %p1398_p7 = pnand %p1397_p6, %p1391_p3 }
   0xf   :  { %1401 = shalt.err (!%p1398_p7)
}
  0x10   :  { %s1451_s11 = smov 384   ;;  %s1452_s12 = smov 24  }
  0x11   :  { %41 = dma.hbm_to_vmem [thread:$0]  %s1591_s3, 24576, %s36_s25, [#allocation5], %s1451_s11, %s1451_s11, %s1452_s12  }
  0x12   :  { %s1453_s15 = smov [#allocation2]   ;;  %s1402_s19 = scalar_lea.hbm %s1589_s1, 1024 }
  0x13   :  { %s21_s16 = sshll.u32 %s1453_s15, 4  ;;  %p1403_p8 = scmp.ne.s32.totalorder %s1589_s1, %s1402_s19  ;;  %s22_s16 = int_to_ptr.vmem [resolvable:$true] %s21_s16 }
  0x14   :  { %p1406_p9 = scmp.lt.u32.totalorder %s1402_s19, %s1589_s1 }
  0x16   :  { %p1408_p10 = pnand %p1406_p9, %p1403_p8 }
  0x18   :  { %1411 = shalt.err (!%p1408_p10)
}
  0x19   :  { %s1412_s24 = scalar_lea.vmem %s22_s16, 1024  ;;  %p1417_p12 = scmp.lt.s32.totalorder %s22_s16, %s22_s16 }
  0x1a   :  { %p1413_p11 = scmp.ne.s32.totalorder %s22_s16, %s1412_s24  ;;  %p1418_p13 = scmp.lt.s32.totalorder %s1412_s24, %s1412_s24 }
  0x1c   :  { %p1419_p0 = por %p1418_p13, %p1417_p12 }
  0x1e   :  { %p1420_p1 = pnand %p1419_p0, %p1413_p11 }
  0x20   :  { %1423 = shalt.err (!%p1420_p1)
}
  0x21   :  { %s1454_s3 = smov 512   ;;  %s1455_s25 = smov 32  }
  0x22   :  { %27 = dma.hbm_to_vmem [thread:$0]  %s1589_s1, 1024, %s22_s16, [#allocation3], %s1454_s3, %s1454_s3, %s1455_s25  }
  0x23   :  { %s1456_s28 = smov [#allocation6]   ;;  %s1424_s9 = scalar_lea.hbm %s1593_s5, 6144 }
  0x24   :  { %s49_s29 = sshll.u32 %s1456_s28, 4  ;;  %p1425_p2 = scmp.ne.s32.totalorder %s1593_s5, %s1424_s9  ;;  %s50_s29 = int_to_ptr.vmem [resolvable:$true] %s49_s29 }
  0x25   :  { %p1428_p3 = scmp.lt.u32.totalorder %s1424_s9, %s1593_s5 }
  0x27   :  { %p1430_p4 = pnand %p1428_p3, %p1425_p2 }
  0x29   :  { %1433 = shalt.err (!%p1430_p4)
}
  0x2a   :  { %s1434_s14 = scalar_lea.vmem %s50_s29, 6144  ;;  %p1439_p6 = scmp.lt.s32.totalorder %s50_s29, %s50_s29 }
  0x2b   :  { %p1435_p5 = scmp.ne.s32.totalorder %s50_s29, %s1434_s14  ;;  %p1440_p7 = scmp.lt.s32.totalorder %s1434_s14, %s1434_s14 }
  0x2d   :  { %p1441_p8 = por %p1440_p7, %p1439_p6 }
  0x2f   :  { %p1442_p9 = pnand %p1441_p8, %p1435_p5 }
  0x31   :  { %1445 = shalt.err (!%p1442_p9)
}
  0x32   :  { %s1457_s1 = smov 128   ;;  %s1458_s15 = smov 8  }
  0x33   :  { %55 = dma.hbm_to_vmem [thread:$0]  %s1593_s5, 6144, %s50_s29, [#allocation5], %s1457_s1, %s1457_s1, %s1458_s15  }
  0x34   :  { %1446 = dma.done.wait [#allocation3], 1024  }
  0x35   :  { %1447 = vsyncadd [#allocation3], 4294966272 }
  0x36   :  { %1448 = dma.done.wait [#allocation5], 30720  }
  0x37   :  { %1449 = vsyncadd [#allocation5], 4294936576  ;;  %v1459_v0 = vmov 0.0   ;;  %v69_v1 = vld [vmem:[#allocation2 + $0x8] sm:$0xff]  ;;  %v68_v3 = vld [vmem:[#allocation2] sm:$0xff]  ;;  %vm98_vm0 = vcmask 130048  }
  0x38   :  { %166 = vmatprep.mubr.f32.mxu0 %v1459_v0  ;;  %237 = vmatprep.mubr.f32.mxu1 %v1459_v0  ;;  %v73_v2 = vld [vmem:[#allocation2 + $0x28] sm:$0xff]  ;;  %v72_v5 = vld [vmem:[#allocation2 + $0x20] sm:$0xff]  ;;  %v71_v6 = vld [vmem:[#allocation2 + $0x18] sm:$0xff]  ;;  %vm1461_vm1 = vmmov 0  }
  0x39   :  { %v1106_v4 = vpack.c.bf16 %v73_v2, %v69_v1  ;;  %v1108_v7 = vpack.c.bf16 %v72_v5, %v68_v3  ;;  %v67_v8 = vld [vmem:[%s1588_s0] sm:$0xff]  ;;  %v75_v9 = vld [vmem:[#allocation2 + $0x38] sm:$0xff]  ;;  %v70_v10 = vld [vmem:[#allocation2 + $0x10] sm:$0xff] }
  0x3a   :  { %v74_v11 = vld [vmem:[#allocation2 + $0x30] sm:$0xff]  ;;  %v1110_v12 = vpack.c.bf16 %v75_v9, %v71_v6  ;;  %v249_v14 = vld [vmem:[#allocation4 + $0x8] sm:$0xff]  ;;  %v252_v15 = vld [vmem:[#allocation4 + $0x20] sm:$0xff] }
  0x3b   :  { %1107 = vmatprep.subr.bf16.mxu0 %v1106_v4  ;;  %v1112_v13 = vpack.c.bf16 %v74_v11, %v70_v10  ;;  %v248_v16 = vld [vmem:[#allocation4] sm:$0xff]  ;;  %v1114_v17 = vpack.c.bf16 %v252_v15, %v249_v14  ;;  %v251_v18 = vld [vmem:[#allocation4 + $0x18] sm:$0xff]  ;;  %v258_v20 = vld [vmem:[#allocation4 + $0x50] sm:$0xff] }
  0x3c   :  { %1109 = vmatpush1.bf16.msra.mxu0 %v1108_v7  ;;  %v255_v19 = vld [vmem:[#allocation4 + $0x38] sm:$0xff]  ;;  %1111 = vmatprep.subr.bf16.mxu1 %v1110_v12  ;;  %v1116_v21 = vpack.c.bf16 %v251_v18, %v248_v16  ;;  %v254_v23 = vld [vmem:[#allocation4 + $0x30] sm:$0xff]  ;;  %v257_v24 = vld [vmem:[#allocation4 + $0x48] sm:$0xff] }
  0x3d   :  { %v1118_v22 = vpack.c.bf16 %v258_v20, %v255_v19  ;;  %1113 = vmatpush1.bf16.msra.mxu1 %v1112_v13  ;;  %1115 = vmatprep.subr.bf16.mxu0 %v1114_v17  ;;  %v261_v25 = vld [vmem:[#allocation4 + $0x68] sm:$0xff]  ;;  %v264_v26 = vld [vmem:[#allocation4 + $0x80] sm:$0xff]  ;;  %v1120_v27 = vpack.c.bf16 %v257_v24, %v254_v23  ;;  %v263_v30 = vld [vmem:[#allocation4 + $0x78] sm:$0xff] }
  0x3e   :  { %v1122_v28 = vpack.c.bf16 %v264_v26, %v261_v25  ;;  %v260_v29 = vld [vmem:[#allocation4 + $0x60] sm:$0xff]  ;;  %v267_v31 = vld [vmem:[#allocation4 + $0x98] sm:$0xff]  ;;  %v270_v32 = vld [vmem:[#allocation4 + $0xb0] sm:$0xff] }
  0x3f   :  { %946 = vmatmul.mubr.msk.f32.vlgmr.msra.gmra.mrb[0].mxu0 %vm98_vm0, %v67_v8  ;;  %v1124_v33 = vpack.c.bf16 %v263_v30, %v260_v29  ;;  %v1126_v34 = vpack.c.bf16 %v270_v32, %v267_v31  ;;  %v266_v35 = vld [vmem:[#allocation4 + $0x90] sm:$0xff]  ;;  %v269_v36 = vld [vmem:[#allocation4 + $0xa8] sm:$0xff]  ;;  %v276_v38 = vld [vmem:[#allocation4 + $0xe0] sm:$0xff] }
  0x40   :  { %1117 = vmatpush1.bf16.msra.mxu0 %v1116_v21  ;;  %947 = vmatmul.mubr.msk.f32.vlgmr.msra.gmra.mrb[0].mxu1 %vm98_vm0, %v67_v8  ;;  %v273_v37 = vld [vmem:[#allocation4 + $0xc8] sm:$0xff]  ;;  %v298_v39 = vld [vmem:[#allocation4 + $0x190] sm:$0xff]  ;;  %v1128_v43 = vpack.c.bf16 %v269_v36, %v266_v35  ;;  %v272_v44 = vld [vmem:[#allocation4 + $0xc0] sm:$0xff] }
  0x41   :  { %1119 = vmatprep.subr.bf16.mxu0 %v1118_v22  ;;  %v301_v40 = vld [vmem:[#allocation4 + $0x1a8] sm:$0xff]  ;;  %v250_v42 = vld [vmem:[#allocation4 + $0x10] sm:$0xff]  ;;  %v275_v45 = vld [vmem:[#allocation4 + $0xd8] sm:$0xff]  ;;  %v1130_v47 = vpack.c.bf16 %v276_v38, %v273_v37 }
  0x42   :  { %v1242_v41 = vpack.c.bf16 %v301_v40, %v298_v39  ;;  %v253_v46 = vld [vmem:[#allocation4 + $0x28] sm:$0xff]  ;;  %v279_v48 = vld [vmem:[#allocation4 + $0xf8] sm:$0xff]  ;;  %v304_v50 = vld [vmem:[#allocation4 + $0x1c0] sm:$0xff]  ;;  %v1132_v58 = vpack.c.bf16 %v275_v45, %v272_v44 }
  0x43   :  { %v1244_v49 = vpack.c.bf16 %v253_v46, %v250_v42  ;;  %v307_v51 = vld [vmem:[#allocation4 + $0x1d8] sm:$0xff]  ;;  %v282_v52 = vld [vmem:[#allocation4 + $0x110] sm:$0xff]  ;;  %v256_v54 = vld [vmem:[#allocation4 + $0x40] sm:$0xff] }
  0x44   :  { %1121 = vmatpush1.bf16.msra.mxu0 %v1120_v27  ;;  %1243 = vmatprep.subr.bf16.mxu1 %v1242_v41  ;;  %v1246_v53 = vpack.c.bf16 %v307_v51, %v304_v50  ;;  %v259_v55 = vld [vmem:[#allocation4 + $0x58] sm:$0xff]  ;;  %v310_v57 = vld [vmem:[#allocation4 + $0x1f0] sm:$0xff]  ;;  %v281_v60 = vld [vmem:[#allocation4 + $0x108] sm:$0xff]  ;;  %v1134_v62 = vpack.c.bf16 %v282_v52, %v279_v48 }
  0x45   :  { %1123 = vmatprep.subr.bf16.mxu0 %v1122_v28  ;;  %1245 = vmatpush3.bf16.msra.mxu1 %v1244_v49  ;;  %v1248_v56 = vpack.c.bf16 %v259_v55, %v256_v54  ;;  %v278_v59 = vld [vmem:[#allocation4 + $0xf0] sm:$0xff]  ;;  %v313_v61 = vld [vmem:[#allocation4 + $0x208] sm:$0xff]  ;;  %v288_v4 = vld [vmem:[#allocation4 + $0x140] sm:$0xff] }
  0x46   :  { %1247 = vmatprep.subr.bf16.mxu1 %v1246_v53  ;;  %v285_v63 = vld [vmem:[#allocation4 + $0x128] sm:$0xff]  ;;  %v1250_v1 = vpack.c.bf16 %v313_v61, %v310_v57  ;;  %v262_v2 = vld [vmem:[#allocation4 + $0x70] sm:$0xff]  ;;  %v316_v5 = vld [vmem:[#allocation4 + $0x220] sm:$0xff]  ;;  %v1136_v8 = vpack.c.bf16 %v281_v60, %v278_v59 }
  0x47   :  { %v265_v3 = vld [vmem:[#allocation4 + $0x88] sm:$0xff]  ;;  %v319_v6 = vld [vmem:[#allocation4 + $0x238] sm:$0xff]  ;;  %v284_v9 = vld [vmem:[#allocation4 + $0x120] sm:$0xff]  ;;  %v1138_v13 = vpack.c.bf16 %v288_v4, %v285_v63 }
  0x48   :  { %1125 = vmatpush1.bf16.msra.mxu0 %v1124_v33  ;;  %v1252_v7 = vpack.c.bf16 %v265_v3, %v262_v2  ;;  %v1254_v10 = vpack.c.bf16 %v319_v6, %v316_v5  ;;  %v268_v11 = vld [vmem:[#allocation4 + $0xa0] sm:$0xff]  ;;  %v271_v12 = vld [vmem:[#allocation4 + $0xb8] sm:$0xff]  ;;  %v322_v15 = vld [vmem:[#allocation4 + $0x250] sm:$0xff] }
  0x49   :  { %1127 = vmatprep.subr.bf16.mxu0 %v1126_v34  ;;  %1249 = vmatpush3.bf16.msra.mxu1 %v1248_v56  ;;  %v287_v14 = vld [vmem:[#allocation4 + $0x138] sm:$0xff]  ;;  %v325_v16 = vld [vmem:[#allocation4 + $0x268] sm:$0xff]  ;;  %v294_v18 = vld [vmem:[#allocation4 + $0x170] sm:$0xff]  ;;  %v1256_v19 = vpack.c.bf16 %v271_v12, %v268_v11 }
  0x4a   :  { %1251 = vmatprep.subr.bf16.mxu1 %v1250_v1  ;;  %v291_v17 = vld [vmem:[#allocation4 + $0x158] sm:$0xff]  ;;  %v1140_v20 = vpack.c.bf16 %v287_v14, %v284_v9  ;;  %v290_v21 = vld [vmem:[#allocation4 + $0x150] sm:$0xff]  ;;  %v1258_v22 = vpack.c.bf16 %v325_v16, %v322_v15  ;;  %v277_v24 = vld [vmem:[#allocation4 + $0xe8] sm:$0xff] }
  0x4b   :  { %v274_v23 = vld [vmem:[#allocation4 + $0xd0] sm:$0xff]  ;;  %v1142_v25 = vpack.c.bf16 %v294_v18, %v291_v17  ;;  %v293_v26 = vld [vmem:[#allocation4 + $0x168] sm:$0xff]  ;;  %v328_v27 = vld [vmem:[#allocation4 + $0x280] sm:$0xff] }
  0x4c   :  { %1129 = vmatpush1.bf16.msra.mxu0 %v1128_v43  ;;  %v331_v28 = vld [vmem:[#allocation4 + $0x298] sm:$0xff]  ;;  %v297_v29 = vld [vmem:[#allocation4 + $0x188] sm:$0xff]  ;;  %v300_v30 = vld [vmem:[#allocation4 + $0x1a0] sm:$0xff]  ;;  %v1260_v31 = vpack.c.bf16 %v277_v24, %v274_v23  ;;  %v1144_v32 = vpack.c.bf16 %v293_v26, %v290_v21 }
  0x4d   :  { %1131 = vmatprep.subr.bf16.mxu0 %v1130_v47  ;;  %1253 = vmatpush3.bf16.msra.mxu1 %v1252_v7  ;;  %v296_v33 = vld [vmem:[#allocation4 + $0x180] sm:$0xff]  ;;  %v1262_v34 = vpack.c.bf16 %v331_v28, %v328_v27  ;;  %v283_v36 = vld [vmem:[#allocation4 + $0x118] sm:$0xff]  ;;  %v1146_v37 = vpack.c.bf16 %v300_v30, %v297_v29  ;;  %v334_v39 = vld [vmem:[#allocation4 + $0x2b0] sm:$0xff] }
  0x4e   :  { %1255 = vmatprep.subr.bf16.mxu1 %v1254_v10  ;;  %v280_v35 = vld [vmem:[#allocation4 + $0x100] sm:$0xff]  ;;  %v299_v38 = vld [vmem:[#allocation4 + $0x198] sm:$0xff]  ;;  %v337_v40 = vld [vmem:[#allocation4 + $0x2c8] sm:$0xff] }
  0x4f   :  { %v303_v41 = vld [vmem:[#allocation4 + $0x1b8] sm:$0xff]  ;;  %v306_v42 = vld [vmem:[#allocation4 + $0x1d0] sm:$0xff]  ;;  %v1264_v43 = vpack.c.bf16 %v283_v36, %v280_v35  ;;  %v1148_v44 = vpack.c.bf16 %v299_v38, %v296_v33  ;;  %v1266_v45 = vpack.c.bf16 %v337_v40, %v334_v39  ;;  %v289_v47 = vld [vmem:[#allocation4 + $0x148] sm:$0xff]  ;;  %v78_v38 = vlaneseq }
  0x50   :  { %1133 = vmatpush1.bf16.msra.mxu0 %v1132_v58  ;;  %v286_v46 = vld [vmem:[#allocation4 + $0x130] sm:$0xff]  ;;  %v1150_v48 = vpack.c.bf16 %v306_v42, %v303_v41  ;;  %v305_v50 = vld [vmem:[#allocation4 + $0x1c8] sm:$0xff]  ;;  %v312_v52 = vld [vmem:[#allocation4 + $0x200] sm:$0xff] }
  0x51   :  { %1135 = vmatprep.subr.bf16.mxu0 %v1134_v62  ;;  %1257 = vmatpush3.bf16.msra.mxu1 %v1256_v19  ;;  %v302_v49 = vld [vmem:[#allocation4 + $0x1b0] sm:$0xff]  ;;  %v309_v51 = vld [vmem:[#allocation4 + $0x1e8] sm:$0xff]  ;;  %v1268_v53 = vpack.c.bf16 %v289_v47, %v286_v46  ;;  %v308_v56 = vld [vmem:[#allocation4 + $0x1e0] sm:$0xff]  ;;  %v1545_v39 = vshrl.u32 %v78_v38, 7 }
  0x52   :  { %1259 = vmatprep.subr.bf16.mxu1 %v1258_v22  ;;  %v1152_v54 = vpack.c.bf16 %v305_v50, %v302_v49  ;;  %v1154_v55 = vpack.c.bf16 %v312_v52, %v309_v51  ;;  %v311_v57 = vld [vmem:[#allocation4 + $0x1f8] sm:$0xff]  ;;  %v318_v59 = vld [vmem:[#allocation4 + $0x230] sm:$0xff]  ;;  %v317_v63 = vld [vmem:[#allocation4 + $0x228] sm:$0xff] }
  0x53   :  { %v315_v58 = vld [vmem:[#allocation4 + $0x218] sm:$0xff]  ;;  %v1156_v60 = vpack.c.bf16 %v311_v57, %v308_v56  ;;  %v314_v62 = vld [vmem:[#allocation4 + $0x210] sm:$0xff]  ;;  %v321_v1 = vld [vmem:[#allocation4 + $0x248] sm:$0xff]  ;;  %v80_v40 = vsub.s32 0, %v1545_v39  ;;  %v84_v42 = vsub.s32 1, %v1545_v39 }
  0x54   :  { %1137 = vmatpush1.bf16.msra.mxu0 %v1136_v8  ;;  %v1158_v61 = vpack.c.bf16 %v318_v59, %v315_v58  ;;  %v324_v2 = vld [vmem:[#allocation4 + $0x260] sm:$0xff]  ;;  %v1160_v3 = vpack.c.bf16 %v317_v63, %v314_v62  ;;  %v323_v6 = vld [vmem:[#allocation4 + $0x258] sm:$0xff]  ;;  %v330_v8 = vld [vmem:[#allocation4 + $0x290] sm:$0xff] }
  0x55   :  { %1139 = vmatprep.subr.bf16.mxu0 %v1138_v13  ;;  %1261 = vmatpush3.bf16.msra.mxu1 %v1260_v31  ;;  %v1162_v4 = vpack.c.bf16 %v324_v2, %v321_v1  ;;  %v320_v5 = vld [vmem:[#allocation4 + $0x240] sm:$0xff]  ;;  %v327_v7 = vld [vmem:[#allocation4 + $0x278] sm:$0xff]  ;;  %v326_v11 = vld [vmem:[#allocation4 + $0x270] sm:$0xff] }
  0x56   :  { %1263 = vmatprep.subr.bf16.mxu1 %v1262_v34  ;;  %v1164_v9 = vpack.c.bf16 %v323_v6, %v320_v5  ;;  %v1166_v10 = vpack.c.bf16 %v330_v8, %v327_v7  ;;  %v329_v12 = vld [vmem:[#allocation4 + $0x288] sm:$0xff]  ;;  %v336_v14 = vld [vmem:[#allocation4 + $0x2c0] sm:$0xff]  ;;  %v335_v18 = vld [vmem:[#allocation4 + $0x2b8] sm:$0xff] }
  0x57   :  { %v333_v13 = vld [vmem:[#allocation4 + $0x2a8] sm:$0xff]  ;;  %v1168_v15 = vpack.c.bf16 %v329_v12, %v326_v11  ;;  %v332_v17 = vld [vmem:[#allocation4 + $0x2a0] sm:$0xff]  ;;  %v342_v21 = vld [vmem:[#allocation4 + $0x2f0] sm:$0xff] }
  0x58   :  { %1141 = vmatpush1.bf16.msra.mxu0 %v1140_v20  ;;  %v1170_v16 = vpack.c.bf16 %v336_v14, %v333_v13  ;;  %v1172_v19 = vpack.c.bf16 %v335_v18, %v332_v17  ;;  %v339_v20 = vld [vmem:[#allocation4 + $0x2d8] sm:$0xff]  ;;  %v340_v22 = vld [vmem:[#allocation4 + $0x2e0] sm:$0xff]  ;;  %v341_v26 = vld [vmem:[#allocation4 + $0x2e8] sm:$0xff] }
  0x59   :  { %1143 = vmatprep.subr.bf16.mxu0 %v1142_v25  ;;  %1265 = vmatpush3.bf16.msra.mxu1 %v1264_v43  ;;  %v1174_v23 = vpack.c.bf16 %v342_v21, %v339_v20  ;;  %v343_v24 = vld [vmem:[#allocation4 + $0x2f8] sm:$0xff]  ;;  %v338_v25 = vld [vmem:[#allocation4 + $0x2d0] sm:$0xff]  ;;  %v292_v29 = vld [vmem:[#allocation4 + $0x160] sm:$0xff]  ;;  %v92_v43 = vsub.s32 3, %v1545_v39 }
  0x5a   :  { %1267 = vmatprep.subr.bf16.mxu1 %v1266_v45  ;;  %v1270_v27 = vpack.c.bf16 %v343_v24, %v340_v22  ;;  %v1176_v28 = vpack.c.bf16 %v341_v26, %v338_v25  ;;  %v295_v30 = vld [vmem:[#allocation4 + $0x178] sm:$0xff]  ;;  %v348_v33 = vld [vmem:[#allocation4 + $0x320] sm:$0xff]  ;;  %v394_v34 = vld [vmem:[#allocation4 + $0x490] sm:$0xff] }
  0x5b   :  { %v1272_v31 = vpack.c.bf16 %v295_v30, %v292_v29  ;;  %v397_v36 = vld [vmem:[#allocation4 + $0x4a8] sm:$0xff]  ;;  %v1551_v41 = vld [vmem:[%s1590_s2] sm:$0xf]  ;;  %v346_v52 = vld [vmem:[#allocation4 + $0x310] sm:$0xff] }
  0x5c   :  { %1145 = vmatpush1.bf16.msra.mxu0 %v1144_v32  ;;  %v345_v32 = vld [vmem:[#allocation4 + $0x308] sm:$0xff]  ;;  %v85_v45 = vrot.slane %v1551_v41, %v84_v42  ;;  %v344_v47 = vld [vmem:[#allocation4 + $0x300] sm:$0xff]  ;;  %v93_v49 = vrot.slane %v1551_v41, %v92_v43  ;;  %v354_v56 = vld [vmem:[#allocation4 + $0x350] sm:$0xff] }
  0x5d   :  { %1147 = vmatprep.subr.bf16.mxu0 %v1146_v37  ;;  %1269 = vmatpush3.bf16.msra.mxu1 %v1268_v53  ;;  %v1178_v35 = vpack.c.bf16 %v348_v33, %v345_v32  ;;  %v1274_v37 = vpack.c.bf16 %v397_v36, %v394_v34  ;;  %v349_v53 = vld [vmem:[#allocation4 + $0x328] sm:$0xff]  ;;  %v400_v57 = vld [vmem:[#allocation4 + $0x4c0] sm:$0xff]  ;;  %v403_v58 = vld [vmem:[#allocation4 + $0x4d8] sm:$0xff] }
  0x5e   :  { %1271 = vmatprep.subr.bf16.mxu1 %v1270_v27  ;;  %v1276_v63 = vpack.c.bf16 %v349_v53, %v346_v52  ;;  %v350_v1 = vld [vmem:[#allocation4 + $0x330] sm:$0xff]  ;;  %v353_v2 = vld [vmem:[#allocation4 + $0x348] sm:$0xff]  ;;  %v1278_v6 = vpack.c.bf16 %v403_v58, %v400_v57  ;;  %v352_v7 = vld [vmem:[#allocation4 + $0x340] sm:$0xff] }
  0x5f   :  { %v355_v8 = vld [vmem:[#allocation4 + $0x358] sm:$0xff]  ;;  %v406_v11 = vld [vmem:[#allocation4 + $0x4f0] sm:$0xff]  ;;  %v409_v12 = vld [vmem:[#allocation4 + $0x508] sm:$0xff]  ;;  %v1184_v14 = vpack.c.bf16 %v353_v2, %v350_v1 }
  0x60   :  { %1149 = vmatpush1.bf16.msra.mxu0 %v1148_v44  ;;  %v81_v44 = vrot.slane %v1551_v41, %v80_v40  ;;  %v359_v17 = vld [vmem:[#allocation4 + $0x378] sm:$0xff]  ;;  %v358_v20 = vld [vmem:[#allocation4 + $0x370] sm:$0xff]  ;;  %v361_v21 = vld [vmem:[#allocation4 + $0x388] sm:$0xff] }
  0x61   :  { %1151 = vmatprep.subr.bf16.mxu0 %v1150_v48  ;;  %1273 = vmatpush3.bf16.msra.mxu1 %v1272_v31  ;;  %v347_v48 = vld [vmem:[#allocation4 + $0x318] sm:$0xff]  ;;  %v412_v24 = vld [vmem:[#allocation4 + $0x520] sm:$0xff]  ;;  %v1284_v27 = vpack.c.bf16 %v361_v21, %v358_v20  ;;  %v365_v29 = vld [vmem:[#allocation4 + $0x3a8] sm:$0xff] }
  0x62   :  { %1275 = vmatprep.subr.bf16.mxu1 %v1274_v37  ;;  %v1180_v62 = vpack.c.bf16 %v347_v48, %v344_v47  ;;  %v363_v22 = vld [vmem:[#allocation4 + $0x398] sm:$0xff]  ;;  %v364_v32 = vld [vmem:[#allocation4 + $0x3a0] sm:$0xff]  ;;  %v369_v34 = vld [vmem:[#allocation4 + $0x3c8] sm:$0xff] }
  0x63   :  { %v415_v25 = vld [vmem:[#allocation4 + $0x538] sm:$0xff]  ;;  %v418_v36 = vld [vmem:[#allocation4 + $0x550] sm:$0xff]  ;;  %v421_v37 = vld [vmem:[#allocation4 + $0x568] sm:$0xff] }
  0x64   :  { %1153 = vmatpush1.bf16.msra.mxu0 %v1152_v54  ;;  %v351_v54 = vld [vmem:[#allocation4 + $0x338] sm:$0xff]  ;;  %v1286_v31 = vpack.c.bf16 %v415_v25, %v412_v24  ;;  %v1290_v47 = vpack.c.bf16 %v421_v37, %v418_v36  ;;  %v370_v48 = vld [vmem:[#allocation4 + $0x3d0] sm:$0xff]  ;;  %v424_v52 = vld [vmem:[#allocation4 + $0x580] sm:$0xff] }
  0x65   :  { %1155 = vmatprep.subr.bf16.mxu0 %v1154_v55  ;;  %v1182_v5 = vpack.c.bf16 %v354_v56, %v351_v54  ;;  %v367_v33 = vld [vmem:[#allocation4 + $0x3b8] sm:$0xff]  ;;  %v374_v56 = vld [vmem:[#allocation4 + $0x3f0] sm:$0xff]  ;;  %v377_v57 = vld [vmem:[#allocation4 + $0x408] sm:$0xff] }
  0x66   :  { %v1288_v43 = vpack.c.bf16 %v367_v33, %v364_v32  ;;  %v427_v53 = vld [vmem:[#allocation4 + $0x598] sm:$0xff]  ;;  %v384_v1 = vld [vmem:[#allocation4 + $0x440] sm:$0xff]  ;;  %v430_v2 = vld [vmem:[#allocation4 + $0x5b0] sm:$0xff] }
  0x67   :  { %v386_v20 = vld [vmem:[#allocation4 + $0x450] sm:$0xff]  ;;  %v388_v24 = vld [vmem:[#allocation4 + $0x460] sm:$0xff]  ;;  %v391_v25 = vld [vmem:[#allocation4 + $0x478] sm:$0xff] }
  0x68   :  { %1157 = vmatpush1.bf16.msra.mxu0 %v1156_v60  ;;  %v395_v32 = vld [vmem:[#allocation4 + $0x498] sm:$0xff] }
  0x69   :  { %1159 = vmatprep.subr.bf16.mxu0 %v1158_v61  ;;  %v399_v33 = vld [vmem:[#allocation4 + $0x4b8] sm:$0xff] }
  0x6c   :  { %1161 = vmatpush1.bf16.msra.mxu0 %v1160_v3 }
  0x6d   :  { %1163 = vmatprep.subr.bf16.mxu0 %v1162_v4 }
  0x70   :  { %1165 = vmatpush1.bf16.msra.mxu0 %v1164_v9  ;;  %v357_v9 = vld [vmem:[#allocation4 + $0x368] sm:$0xff] }
  0x71   :  { %1167 = vmatprep.subr.bf16.mxu0 %v1166_v10  ;;  %v360_v10 = vld [vmem:[#allocation4 + $0x380] sm:$0xff] }
  0x72   :  { %v1186_v18 = vpack.c.bf16 %v360_v10, %v357_v9 }
  0x74   :  { %1169 = vmatpush1.bf16.msra.mxu0 %v1168_v15  ;;  %v1280_v15 = vpack.c.bf16 %v355_v8, %v352_v7  ;;  %v380_v7 = vld [vmem:[#allocation4 + $0x420] sm:$0xff]  ;;  %v383_v8 = vld [vmem:[#allocation4 + $0x438] sm:$0xff] }
  0x75   :  { %1171 = vmatprep.subr.bf16.mxu0 %v1170_v16  ;;  %v356_v16 = vld [vmem:[#allocation4 + $0x360] sm:$0xff] }
  0x76   :  { %v1188_v26 = vpack.c.bf16 %v359_v17, %v356_v16  ;;  %v439_v16 = vld [vmem:[#allocation4 + $0x5f8] sm:$0xff] }
  0x78   :  { %1173 = vmatpush1.bf16.msra.mxu0 %v1172_v19  ;;  %v1282_v19 = vpack.c.bf16 %v409_v12, %v406_v11  ;;  %v382_v11 = vld [vmem:[#allocation4 + $0x430] sm:$0xff]  ;;  %v385_v12 = vld [vmem:[#allocation4 + $0x448] sm:$0xff] }
  0x79   :  { %1175 = vmatprep.subr.bf16.mxu0 %v1174_v23  ;;  %v366_v23 = vld [vmem:[#allocation4 + $0x3b0] sm:$0xff] }
  0x7a   :  { %v1190_v30 = vpack.c.bf16 %v366_v23, %v363_v22  ;;  %v389_v23 = vld [vmem:[#allocation4 + $0x468] sm:$0xff] }
  0x7c   :  { %1177 = vmatpush1.bf16.msra.mxu0 %v1176_v28  ;;  %v362_v28 = vld [vmem:[#allocation4 + $0x390] sm:$0xff] }
  0x7d   :  { %1179 = vmatprep.subr.bf16.mxu0 %v1178_v35  ;;  %v372_v35 = vld [vmem:[#allocation4 + $0x3e0] sm:$0xff]  ;;  %v1192_v38 = vpack.c.bf16 %v365_v29, %v362_v28  ;;  %v1304_v29 = vpack.c.bf16 %v391_v25, %v388_v24  ;;  %v760_v25 = vld [vmem:[#allocation6 + $0x90] sm:$0xff] }
 0x112   :  { %v168_v46 = vpop.f32.mrb[0].mxu0 }
 0x113   :  { %v169_v50 = vadd.f32 %v168_v46, %v81_v44  ;;  %v170_v51 = vpop.f32.mrb[1].mxu0  ;;  %v1562_v59 = vpop.f32.mrb[0].mxu1  ;;  %v368_v44 = vld [vmem:[#allocation4 + $0x3c0] sm:$0xff]  ;;  %v1194_v46 = vpack.c.bf16 %v372_v35, %v369_v34  ;;  %v402_v34 = vld [vmem:[#allocation4 + $0x4d0] sm:$0xff] }
 0x114   :  { %v171_v55 = vadd.f32 %v170_v51, %v85_v45  ;;  %v241_v60 = vpop.f32.mrb[1].mxu1  ;;  %v371_v45 = vld [vmem:[#allocation4 + $0x3d8] sm:$0xff]  ;;  %v378_v51 = vld [vmem:[#allocation4 + $0x410] sm:$0xff]  ;;  %v1214_v37 = vpack.c.bf16 %v402_v34, %v399_v33  ;;  %v746_v33 = vld [vmem:[#allocation6 + $0x20] sm:$0xff] }
 0x115   :  { %v242_v3 = vadd.f32 %v241_v60, %v93_v49  ;;  %v244_v4 = vmax.f32 %v169_v50, 0.0  ;;  %v373_v49 = vld [vmem:[#allocation4 + $0x3e8] sm:$0xff]  ;;  %v375_v50 = vld [vmem:[#allocation4 + $0x3f8] sm:$0xff]  ;;  %v1196_v54 = vpack.c.bf16 %v371_v45, %v368_v44  ;;  %v1294_v60 = vpack.c.bf16 %v427_v53, %v424_v52  ;;  %v408_v44 = vld [vmem:[#allocation4 + $0x500] sm:$0xff] }
 0x116   :  { %v245_v61 = vmax.f32 %v171_v55, 0.0  ;;  %v1292_v55 = vpack.c.bf16 %v373_v49, %v370_v48  ;;  %v1198_v58 = vpack.c.bf16 %v378_v51, %v375_v50  ;;  %v407_v48 = vld [vmem:[#allocation4 + $0x4f8] sm:$0xff]  ;;  %v414_v50 = vld [vmem:[#allocation4 + $0x530] sm:$0xff]  ;;  %v747_v34 = vld [vmem:[#allocation6 + $0x28] sm:$0xff] }
 0x117   :  { %v247_v13 = vmax.f32 %v242_v3, 0.0  ;;  %v433_v3 = vld [vmem:[#allocation4 + $0x5c8] sm:$0xff]  ;;  %v411_v49 = vld [vmem:[#allocation4 + $0x518] sm:$0xff]  ;;  %v410_v53 = vld [vmem:[#allocation4 + $0x510] sm:$0xff] }
 0x118   :  { %521 = vmatprep.mubr.f32.mxu0 %v245_v61  ;;  %663 = vmatprep.mubr.f32.mxu1 %v245_v61  ;;  %v376_v61 = vld [vmem:[#allocation4 + $0x400] sm:$0xff]  ;;  %v1298_v10 = vpack.c.bf16 %v433_v3, %v430_v2  ;;  %v1222_v52 = vpack.c.bf16 %v414_v50, %v411_v49  ;;  %v422_v3 = vld [vmem:[#allocation4 + $0x570] sm:$0xff]  ;;  %v751_v49 = vld [vmem:[#allocation6 + $0x48] sm:$0xff] }
 0x119   :  { %522 = vmatmul.mubr.f32.vlgmr.msra.gmra.mrb[2].mxu0 %v244_v4  ;;  %664 = vmatmul.mubr.f32.vlgmr.msra.gmra.mrb[2].mxu1 %v244_v4  ;;  %v88_v4 = vsub.s32 2, %v1545_v39  ;;  %v768_v50 = vld [vmem:[#allocation6 + $0xd0] sm:$0xff]  ;;  %v778_v39 = vld [vmem:[#allocation6 + $0x120] sm:$0xff] }
 0x11a   :  { %1181 = vmatpush1.bf16.msra.mxu0 %v1180_v62  ;;  %1277 = vmatpush3.bf16.msra.mxu1 %v1276_v63  ;;  %v379_v62 = vld [vmem:[#allocation4 + $0x418] sm:$0xff]  ;;  %v381_v63 = vld [vmem:[#allocation4 + $0x428] sm:$0xff] }
 0x11b   :  { %1183 = vmatprep.subr.bf16.mxu0 %v1182_v5  ;;  %1279 = vmatprep.subr.bf16.mxu1 %v1278_v6  ;;  %v1200_v5 = vpack.c.bf16 %v377_v57, %v374_v56  ;;  %v1296_v6 = vpack.c.bf16 %v379_v62, %v376_v61  ;;  %v1202_v9 = vpack.c.bf16 %v384_v1, %v381_v63  ;;  %v420_v56 = vld [vmem:[#allocation4 + $0x560] sm:$0xff]  ;;  %v419_v61 = vld [vmem:[#allocation4 + $0x558] sm:$0xff]  ;;  %v426_v63 = vld [vmem:[#allocation4 + $0x590] sm:$0xff] }
 0x11c   :  { %733 = vmatprep.mubr.f32.mxu1 %v247_v13  ;;  %592 = vmatprep.mubr.f32.mxu0 %v247_v13  ;;  %v387_v13 = vld [vmem:[#allocation4 + $0x458] sm:$0xff]  ;;  %v89_v17 = vrot.slane %v1551_v41, %v88_v4  ;;  %v1208_v41 = vpack.c.bf16 %v389_v23, %v386_v20  ;;  %v759_v20 = vld [vmem:[#allocation6 + $0x88] sm:$0xff] }
 0x11d   :  { %v423_v62 = vld [vmem:[#allocation4 + $0x578] sm:$0xff]  ;;  %v743_v23 = vld [vmem:[#allocation6 + $0x8] sm:$0xff] }
 0x11e   :  { %1185 = vmatpush1.bf16.msra.mxu0 %v1184_v14  ;;  %1281 = vmatpush3.bf16.msra.mxu1 %v1280_v15  ;;  %v390_v14 = vld [vmem:[#allocation4 + $0x470] sm:$0xff]  ;;  %v436_v15 = vld [vmem:[#allocation4 + $0x5e0] sm:$0xff]  ;;  %v1569_v28 = vadd.f32 %v1562_v59, %v89_v17  ;;  %v1230_v2 = vpack.c.bf16 %v426_v63, %v423_v62  ;;  %v437_v17 = vld [vmem:[#allocation4 + $0x5e8] sm:$0xff] }
 0x11f   :  { %1187 = vmatprep.subr.bf16.mxu0 %v1186_v18  ;;  %1283 = vmatprep.subr.bf16.mxu1 %v1282_v19  ;;  %v1204_v18 = vpack.c.bf16 %v383_v8, %v380_v7  ;;  %v1300_v19 = vpack.c.bf16 %v385_v12, %v382_v11  ;;  %v1206_v21 = vpack.c.bf16 %v390_v14, %v387_v13  ;;  %v398_v59 = vld [vmem:[#allocation4 + $0x4b0] sm:$0xff]  ;;  %v432_v7 = vld [vmem:[#allocation4 + $0x5c0] sm:$0xff]  ;;  %v431_v11 = vld [vmem:[#allocation4 + $0x5b8] sm:$0xff] }
 0x120   :  { %v1302_v22 = vpack.c.bf16 %v439_v16, %v436_v15  ;;  %v246_v35 = vmax.f32 %v1569_v28, 0.0  ;;  %v435_v12 = vld [vmem:[#allocation4 + $0x5d8] sm:$0xff]  ;;  %v438_v13 = vld [vmem:[#allocation4 + $0x5f0] sm:$0xff]  ;;  %v755_v62 = vld [vmem:[#allocation6 + $0x68] sm:$0xff] }
 0x121   :  { %v1238_v15 = vpack.c.bf16 %v438_v13, %v435_v12  ;;  %v434_v16 = vld [vmem:[#allocation4 + $0x5d0] sm:$0xff]  ;;  %v440_v12 = vld [vmem:[%s1592_s4] sm:$0x7] }
 0x122   :  { %1189 = vmatpush1.bf16.msra.mxu0 %v1188_v26  ;;  %1285 = vmatpush3.bf16.msra.mxu1 %v1284_v27  ;;  %v393_v26 = vld [vmem:[#allocation4 + $0x488] sm:$0xff]  ;;  %v396_v27 = vld [vmem:[#allocation4 + $0x4a0] sm:$0xff]  ;;  %v453_v13 = vrot.slane %v440_v12, %v88_v4 }
 0x123   :  { %1191 = vmatprep.subr.bf16.mxu0 %v1190_v30  ;;  %1287 = vmatprep.subr.bf16.mxu1 %v1286_v31  ;;  %v1210_v30 = vpack.c.bf16 %v396_v27, %v393_v26  ;;  %v392_v31 = vld [vmem:[#allocation4 + $0x480] sm:$0xff]  ;;  %v761_v26 = vld [vmem:[#allocation6 + $0x98] sm:$0xff]  ;;  %v744_v27 = vld [vmem:[#allocation6 + $0x10] sm:$0xff] }
 0x124   :  { %v1212_v36 = vpack.c.bf16 %v395_v32, %v392_v31  ;;  %v1310_v28 = vpack.c.bf16 %v761_v26, %v760_v25  ;;  %v775_v25 = vld [vmem:[#allocation6 + $0x108] sm:$0xff] }
 0x126   :  { %1193 = vmatpush1.bf16.msra.mxu0 %v1192_v38  ;;  %1289 = vmatpush3.bf16.msra.mxu1 %v1288_v43  ;;  %v401_v38 = vld [vmem:[#allocation4 + $0x4c8] sm:$0xff] }
 0x127   :  { %1195 = vmatprep.subr.bf16.mxu0 %v1194_v46  ;;  %1291 = vmatprep.subr.bf16.mxu1 %v1290_v47  ;;  %v405_v43 = vld [vmem:[#allocation4 + $0x4e8] sm:$0xff]  ;;  %v1216_v45 = vpack.c.bf16 %v401_v38, %v398_v59  ;;  %v404_v47 = vld [vmem:[#allocation4 + $0x4e0] sm:$0xff]  ;;  %v748_v38 = vld [vmem:[#allocation6 + $0x30] sm:$0xff] }
 0x128   :  { %v1218_v46 = vpack.c.bf16 %v408_v44, %v405_v43  ;;  %v1220_v51 = vpack.c.bf16 %v407_v48, %v404_v47  ;;  %v749_v43 = vld [vmem:[#allocation6 + $0x38] sm:$0xff]  ;;  %v766_v44 = vld [vmem:[#allocation6 + $0xc0] sm:$0xff] }
 0x129   :  { %v750_v48 = vld [vmem:[#allocation6 + $0x40] sm:$0xff] }
 0x12a   :  { %1197 = vmatpush1.bf16.msra.mxu0 %v1196_v54  ;;  %1293 = vmatpush3.bf16.msra.mxu1 %v1292_v55  ;;  %v413_v54 = vld [vmem:[#allocation4 + $0x528] sm:$0xff] }
 0x12b   :  { %1199 = vmatprep.subr.bf16.mxu0 %v1198_v58  ;;  %1295 = vmatprep.subr.bf16.mxu1 %v1294_v60  ;;  %v417_v55 = vld [vmem:[#allocation4 + $0x548] sm:$0xff]  ;;  %v1224_v57 = vpack.c.bf16 %v413_v54, %v410_v53  ;;  %v416_v60 = vld [vmem:[#allocation4 + $0x540] sm:$0xff]  ;;  %v752_v54 = vld [vmem:[#allocation6 + $0x50] sm:$0xff] }
 0x12c   :  { %v1226_v58 = vpack.c.bf16 %v420_v56, %v417_v55  ;;  %v1228_v1 = vpack.c.bf16 %v419_v61, %v416_v60  ;;  %v753_v55 = vld [vmem:[#allocation6 + $0x58] sm:$0xff]  ;;  %v770_v56 = vld [vmem:[#allocation6 + $0xe0] sm:$0xff] }
 0x12d   :  { %v754_v61 = vld [vmem:[#allocation6 + $0x60] sm:$0xff] }
 0x12e   :  { %1201 = vmatpush1.bf16.msra.mxu0 %v1200_v5  ;;  %1297 = vmatpush3.bf16.msra.mxu1 %v1296_v6  ;;  %v425_v5 = vld [vmem:[#allocation4 + $0x588] sm:$0xff]  ;;  %v1332_v63 = vpack.c.bf16 %v755_v62, %v754_v61 }
 0x12f   :  { %1203 = vmatprep.subr.bf16.mxu0 %v1202_v9  ;;  %1299 = vmatprep.subr.bf16.mxu1 %v1298_v10  ;;  %v429_v6 = vld [vmem:[#allocation4 + $0x5a8] sm:$0xff]  ;;  %v1232_v8 = vpack.c.bf16 %v425_v5, %v422_v3  ;;  %v428_v10 = vld [vmem:[#allocation4 + $0x5a0] sm:$0xff]  ;;  %v756_v5 = vld [vmem:[#allocation6 + $0x70] sm:$0xff] }
 0x130   :  { %v1234_v9 = vpack.c.bf16 %v432_v7, %v429_v6  ;;  %v1236_v14 = vpack.c.bf16 %v431_v11, %v428_v10  ;;  %v757_v6 = vld [vmem:[#allocation6 + $0x78] sm:$0xff] }
 0x131   :  { %v1336_v7 = vpack.c.bf16 %v757_v6, %v756_v5 }
 0x132   :  { %1205 = vmatpush1.bf16.msra.mxu0 %v1204_v18  ;;  %1301 = vmatpush3.bf16.msra.mxu1 %v1300_v19  ;;  %v1240_v18 = vpack.c.bf16 %v437_v17, %v434_v16  ;;  %v758_v19 = vld [vmem:[#allocation6 + $0x80] sm:$0xff] }
 0x133   :  { %1207 = vmatprep.subr.bf16.mxu0 %v1206_v21  ;;  %1303 = vmatprep.subr.bf16.mxu1 %v1302_v22  ;;  %v1306_v21 = vpack.c.bf16 %v759_v20, %v758_v19  ;;  %v742_v22 = vld [vmem:[#allocation6] sm:$0xff]  ;;  %v445_v19 = vrot.slane %v440_v12, %v80_v40  ;;  %v449_v20 = vrot.slane %v440_v12, %v84_v42  ;;  %v779_v40 = vld [vmem:[#allocation6 + $0x128] sm:$0xff] }
 0x134   :  { %v1308_v24 = vpack.c.bf16 %v743_v23, %v742_v22  ;;  %v1345_v42 = vpack.c.bf16 %v779_v40, %v778_v39 }
 0x136   :  { %1209 = vmatpush1.bf16.msra.mxu0 %v1208_v41  ;;  %1305 = vmatpush3.bf16.msra.mxu1 %v1304_v29  ;;  %v745_v41 = vld [vmem:[#allocation6 + $0x18] sm:$0xff]  ;;  %v762_v29 = vld [vmem:[#allocation6 + $0xa0] sm:$0xff] }
 0x137   :  { %1211 = vmatprep.subr.bf16.mxu0 %v1210_v30  ;;  %1307 = vmatprep.subr.bf16.mxu1 %v1306_v21  ;;  %v763_v30 = vld [vmem:[#allocation6 + $0xa8] sm:$0xff]  ;;  %v1312_v31 = vpack.c.bf16 %v745_v41, %v744_v27  ;;  %v776_v41 = vld [vmem:[#allocation6 + $0x110] sm:$0xff] }
 0x138   :  { %v1314_v32 = vpack.c.bf16 %v763_v30, %v762_v29  ;;  %v777_v29 = vld [vmem:[#allocation6 + $0x118] sm:$0xff] }
 0x139   :  { %734 = vmatmul.mubr.f32.vlgmr.msra.gmra.mrb[4].mxu1 %v246_v35  ;;  %v1342_v30 = vpack.c.bf16 %v777_v29, %v776_v41 }
 0x13a   :  { %1213 = vmatpush1.bf16.msra.mxu0 %v1212_v36  ;;  %1309 = vmatpush3.bf16.msra.mxu1 %v1308_v24  ;;  %v765_v36 = vld [vmem:[#allocation6 + $0xb8] sm:$0xff]  ;;  %v774_v24 = vld [vmem:[#allocation6 + $0x100] sm:$0xff] }
 0x13b   :  { %1215 = vmatprep.subr.bf16.mxu0 %v1214_v37  ;;  %1311 = vmatprep.subr.bf16.mxu1 %v1310_v28  ;;  %v1316_v37 = vpack.c.bf16 %v747_v34, %v746_v33  ;;  %v1339_v28 = vpack.c.bf16 %v775_v25, %v774_v24  ;;  %v782_v34 = vld [vmem:[#allocation6 + $0x140] sm:$0xff] }
 0x13e   :  { %1217 = vmatpush1.bf16.msra.mxu0 %v1216_v45  ;;  %1313 = vmatpush3.bf16.msra.mxu1 %v1312_v31  ;;  %v767_v45 = vld [vmem:[#allocation6 + $0xc8] sm:$0xff]  ;;  %v780_v31 = vld [vmem:[#allocation6 + $0x130] sm:$0xff] }
 0x13f   :  { %1219 = vmatprep.subr.bf16.mxu0 %v1218_v46  ;;  %1315 = vmatprep.subr.bf16.mxu1 %v1314_v32  ;;  %v1320_v46 = vpack.c.bf16 %v749_v43, %v748_v38  ;;  %v1322_v47 = vpack.c.bf16 %v767_v45, %v766_v44  ;;  %v781_v32 = vld [vmem:[#allocation6 + $0x138] sm:$0xff]  ;;  %v786_v38 = vld [vmem:[#allocation6 + $0x160] sm:$0xff]  ;;  %v787_v43 = vld [vmem:[#allocation6 + $0x168] sm:$0xff] }
 0x140   :  { %v1348_v33 = vpack.c.bf16 %v781_v32, %v780_v31  ;;  %v1357_v44 = vpack.c.bf16 %v787_v43, %v786_v38  ;;  %v788_v45 = vld [vmem:[#allocation6 + $0x170] sm:$0xff] }
 0x142   :  { %1221 = vmatpush1.bf16.msra.mxu0 %v1220_v51  ;;  %1317 = vmatpush3.bf16.msra.mxu1 %v1316_v37  ;;  %v769_v51 = vld [vmem:[#allocation6 + $0xd8] sm:$0xff]  ;;  %v784_v37 = vld [vmem:[#allocation6 + $0x150] sm:$0xff] }
 0x143   :  { %1223 = vmatprep.subr.bf16.mxu0 %v1222_v52  ;;  %v1324_v52 = vpack.c.bf16 %v751_v49, %v750_v48  ;;  %v1326_v53 = vpack.c.bf16 %v769_v51, %v768_v50 }
 0x146   :  { %1225 = vmatpush1.bf16.msra.mxu0 %v1224_v57  ;;  %v771_v57 = vld [vmem:[#allocation6 + $0xe8] sm:$0xff] }
 0x147   :  { %1227 = vmatprep.subr.bf16.mxu0 %v1226_v58  ;;  %v1328_v58 = vpack.c.bf16 %v753_v55, %v752_v54  ;;  %v1330_v60 = vpack.c.bf16 %v771_v57, %v770_v56 }
 0x14a   :  { %1229 = vmatpush1.bf16.msra.mxu0 %v1228_v1  ;;  %v772_v1 = vld [vmem:[#allocation6 + $0xf0] sm:$0xff] }
 0x14b   :  { %1231 = vmatprep.subr.bf16.mxu0 %v1230_v2  ;;  %v773_v2 = vld [vmem:[#allocation6 + $0xf8] sm:$0xff] }
 0x14c   :  { %v1334_v3 = vpack.c.bf16 %v773_v2, %v772_v1 }
 0x14e   :  { %1233 = vmatpush1.bf16.msra.mxu0 %v1232_v8  ;;  %v1460_v8 = vmov 0.0|0.0  }
 0x14f   :  { %1235 = vmatprep.subr.bf16.mxu0 %v1234_v9 }
 0x152   :  { %1237 = vmatpush1.bf16.msra.mxu0 %v1236_v14 }
 0x153   :  { %1239 = vmatprep.subr.bf16.mxu0 %v1238_v15 }
 0x156   :  { %1241 = vmatpush1.bf16.msra.mxu0 %v1240_v18 }
 0x159   :  { %593 = vmatmul.mubr.f32.vlgmr.msra.gmra.mrb[2].mxu0 %v246_v35  ;;  %v764_v35 = vld [vmem:[#allocation6 + $0xb0] sm:$0xff] }
 0x15a   :  { %v1318_v59 = vpack.c.bf16 %v765_v36, %v764_v35  ;;  %v783_v35 = vld [vmem:[#allocation6 + $0x148] sm:$0xff] }
 0x15b   :  { %v1351_v36 = vpack.c.bf16 %v783_v35, %v782_v34 }
 0x15c   :  { %1319 = vmatprep.subr.bf16.mxu1 %v1318_v59  ;;  %v785_v59 = vld [vmem:[#allocation6 + $0x158] sm:$0xff] }
 0x15d   :  { %1321 = vmatpush3.bf16.msra.mxu1 %v1320_v46  ;;  %v789_v46 = vld [vmem:[#allocation6 + $0x178] sm:$0xff] }
 0x15e   :  { %1323 = vmatprep.subr.bf16.mxu1 %v1322_v47  ;;  %v1360_v47 = vpack.c.bf16 %v789_v46, %v788_v45 }
 0x161   :  { %1325 = vmatpush3.bf16.msra.mxu1 %v1324_v52  ;;  %v948_v52 = vld [vmem:[%s1594_s6] ss:$0 sm:$0xff] }
 0x162   :  { %1327 = vmatprep.subr.bf16.mxu1 %v1326_v53 }
 0x165   :  { %1329 = vmatpush3.bf16.msra.mxu1 %v1328_v58 }
 0x166   :  { %1331 = vmatprep.subr.bf16.mxu1 %v1330_v60 }
 0x169   :  { %1333 = vmatpush3.bf16.msra.mxu1 %v1332_v63 }
 0x16a   :  { %1335 = vmatprep.subr.bf16.mxu1 %v1334_v3 }
 0x16d   :  { %1337 = vmatpush3.bf16.msra.mxu1 %v1336_v7 }
 0x16e   :  { %1338 = vmatprep.subr.bf16.mxu1 %v1460_v8 }
 0x1ec   :  { %v981_v9 = vpop.f32.mrb[2].mxu1 }
 0x1ed   :  { %v982_v10 = vpop.f32.mrb[3].mxu1 }
 0x1ee   :  { %v983_v11 = vadd.f32 %v982_v10, %v981_v9 }
 0x1f0   :  { %v666_v16 = vadd.f32 %v983_v11, %v453_v13 }
 0x20c   :  { %v1016_v14 = vpop.f32.mrb[4].mxu1 }
 0x20d   :  { %v1017_v15 = vpop.f32.mrb[5].mxu1 }
 0x20e   :  { %v1018_v17 = vadd.f32 %v1017_v15, %v1016_v14 }
 0x210   :  { %v736_v18 = vadd.f32 %v1018_v17, %v666_v16 }
 0x212   :  { %v741_v48 = vmax.f32 %v736_v18, 0.0 }
 0x22c   :  { %v594_v21 = vpop.f32.mrb[2].mxu0 }
 0x22d   :  { %v1362_v22 = vadd.f32 %v594_v21, %v445_v19  ;;  %v596_v23 = vpop.f32.mrb[3].mxu0 }
 0x22e   :  { %v1363_v26 = vadd.f32 %v596_v23, %v449_v20 }
 0x22f   :  { %v739_v4 = vmax.f32 %v1362_v22, 0.0 }
 0x230   :  { %v740_v27 = vmax.f32 %v1363_v26, 0.0 }
 0x232   :  { %861 = vmatprep.mubr.f32.mxu1 %v740_v27 }
 0x233   :  { %862 = vmatmul.mubr.f32.vlgmr.msra.gmra.mrb[6].mxu1 %v739_v4 }
 0x234   :  { %1340 = vmatpush3.bf16.msra.mxu1 %v1339_v28  ;;  %1103 = vmatprep.mubr.msk.f32.mxu1 %vm1461_vm1, %v1459_v0  ;;  %v1354_v0 = vpack.c.bf16 %v785_v59, %v784_v37 }
 0x235   :  { %1341 = vmatprep.subr.bf16.mxu1 %v1460_v8 }
 0x238   :  { %1343 = vmatpush3.bf16.msra.mxu1 %v1342_v30 }
 0x239   :  { %1344 = vmatprep.subr.bf16.mxu1 %v1460_v8 }
 0x23c   :  { %1346 = vmatpush3.bf16.msra.mxu1 %v1345_v42 }
 0x23d   :  { %1347 = vmatprep.subr.bf16.mxu1 %v1460_v8 }
 0x240   :  { %1349 = vmatpush3.bf16.msra.mxu1 %v1348_v33 }
 0x241   :  { %1350 = vmatprep.subr.bf16.mxu1 %v1460_v8 }
 0x244   :  { %1352 = vmatpush3.bf16.msra.mxu1 %v1351_v36 }
 0x245   :  { %1353 = vmatprep.subr.bf16.mxu1 %v1460_v8 }
 0x248   :  { %1355 = vmatpush3.bf16.msra.mxu1 %v1354_v0 }
 0x249   :  { %1356 = vmatprep.subr.bf16.mxu1 %v1460_v8 }
 0x24c   :  { %1358 = vmatpush3.bf16.msra.mxu1 %v1357_v44 }
 0x24d   :  { %1359 = vmatprep.subr.bf16.mxu1 %v1460_v8 }
 0x250   :  { %1361 = vmatpush3.bf16.msra.mxu1 %v1360_v47 }
 0x253   :  { %1104 = vmatmul.mubr.f32.vlgmr.msra.gmra.mrb[8].mxu1 %v741_v48 }
 0x306   :  { %v1051_v49 = vpop.f32.mrb[6].mxu1 }
 0x307   :  { %v1052_v50 = vpop.f32.mrb[7].mxu1 }
 0x308   :  { %v1053_v51 = vadd.f32 %v1052_v50, %v1051_v49 }
 0x30a   :  { %v864_v53 = vadd.f32 %v1053_v51, %v948_v52 }
 0x326   :  { %v933_v54 = vpop.f32.mrb[8].mxu1 }
 0x327   :  { %v934_v55 = vadd.f32 %v933_v54, %v864_v53  ;;  %v1105_v56 = vpop.f32.mrb[9].mxu1 }
 0x329   :  { %1378 = vtanh.f32 %v934_v55 }
 0x333   :  { %v1379_v57 = vpop.eup %1378 }
 0x334   :  { %v938_v58 = vmul.f32 2.0, %v1379_v57 }
 0x336   :  { %939 = vst [vmem:[%s1595_s7] sm:$0xff] %v938_v58 }
 0x337   :  { %944 = vsyncpa [#allocation3], 1 }
 0x338   :  { %945 = vsyncpa [#allocation5], 1 }

</bundles_post_ra>
